<compile_context>
chip_gen: v6e
topology: v6e:2x2x1
jax: 0.10.0
libtpu: 0.0.40
codegen_flags: <defaults>
</compile_context>

<pallas_src>
import jax
import jax.numpy as jnp
import numpy as np
from jax.experimental import pallas as pl
from jax.experimental.pallas import tpu as pltpu


def _round_up(x, m):
    return -(-x // m) * m


def _linear_mlp_kernel(ep_ref, invlen_ref, w1_ref, b1_ref, w2_ref, b2_ref,
                       out_ref):
    """One batch tile: mean pool over S, then Linear->ReLU->Linear(H->1).

    ep_ref:  (Bt, S, E) bf16/f32   invlen_ref: (Bt, 1) f32
    w1_ref:  (E, H) f32            b1_ref:     (1, H) f32
    w2_ref:  (1, H) f32 (second-layer weight row)
    b2_ref:  (1, 1) f32 in SMEM    out_ref:    (Bt, 1) f32
    """
    # Sum-pool over the sequence axis; accumulate in f32 regardless of the
    # storage dtype of the epitope stream.
    # TODO(synk): if v7x profiling shows the sublane (XLU) reduction exposed
    # under the faster HBM stream, restructure as an unrolled accumulate of
    # (Bt, E) slices.
    pooled = jnp.sum(ep_ref[...].astype(jnp.float32), axis=1)      # (Bt, E)
    inv = invlen_ref[...]                                          # (Bt, 1)

    E = ep_ref.shape[-1]
    H = w1_ref.shape[-1]
    # 1/length is a per-row scalar, so it commutes with the linear layer;
    # apply it on the narrower side (fewer VPU multiplies).
    if H <= E:
        h = jnp.dot(pooled, w1_ref[...],
                    preferred_element_type=jnp.float32) * inv + b1_ref[...]
    else:
        h = jnp.dot(pooled * inv, w1_ref[...],
                    preferred_element_type=jnp.float32) + b1_ref[...]
    h = jnp.maximum(h, 0.0)   # ReLU; Dropout(0.3) is identity at inference.

    # Linear(H -> 1) as a lane reduction (VPU/XLU) instead of a 1-wide matmul.
    out = jnp.sum(h * w2_ref[...], axis=-1, keepdims=True) + b2_ref[0, 0]
    out_ref[...] = out.astype(out_ref.dtype)


def linear_forward(epitope, mask, w1, b1, w2, b2, *, antigen_full=None,
                   input_dtype=jnp.bfloat16):
    """Full forward pass. epitope [B,S,E], mask [B,S] -> output [B].

    `antigen_full` is accepted for signature parity but unused (the torch
    forward never touches it).
    NOTE: `input_dtype=bf16` (default) halves the HBM bytes of the dominant
    epitope stream but is a small numerics change vs torch f32; pass
    input_dtype=jnp.float32 for exact parity.
    """
    del antigen_full
    B, S, E = epitope.shape
    H = w1.shape[1]

    # Reciprocal lengths computed in the wrapper so the (B, S) mask never has
    # to be DMA'd into the kernel.
    lengths = jnp.sum(mask.astype(jnp.float32), axis=1, keepdims=True)  # (B,1)
    # NOTE: an all-zero mask row yields inf/nan, matching torch's div-by-zero.
    inv_len = 1.0 / lengths

    ep = epitope.astype(input_dtype)
    itemsize = jnp.dtype(input_dtype).itemsize
    sub = {4: 8, 2: 16, 1: 32}.get(itemsize, 8)   # sublane packing multiple

    # ---- padding-aware VMEM accounting -------------------------------------
    # One batch row of the (b_tile, S, E) block occupies a lane/sublane-padded
    # (ceil(S/sub)*sub) x (ceil(E/128)*128) slab in VMEM.
    slab = _round_up(S, sub) * _round_up(E, 128) * itemsize
    # Double-buffered epitope slab + lane-padded inv_len and output columns.
    per_row = 2 * (slab + 128 * 4 + 128 * 4)
    # VMEM-resident weights/biases (still double-buffered by the pipeline).
    fixed = 2 * (_round_up(E, 8) * _round_up(H, 128) * 4
                 + 2 * 8 * _round_up(H, 128) * 4)

    try:  # 64 MiB/TC on v7x, 128 MiB on v5e/v6e.
        vmem_cap = int(pltpu.get_tpu_info().vmem_capacity_bytes)
    except Exception:
        vmem_cap = 64 * 1024 * 1024   # conservative fallback (v7x per-TC size)

    budget = int(vmem_cap * 0.75) - fixed - (2 << 20)
    budget = max(budget, per_row * 8)
    max_rows = max(8, (budget // per_row) // 8 * 8)
    # TODO(synk): if even 8 rows exceed VMEM (huge S*E), add S as a trailing
    # "arbitrary" grid axis with a (b_tile, E) f32 accumulator.

    # ---- batch tiling: fill the budget, keep >=2 steps when batch allows ----
    B8 = _round_up(B, 8)
    cand = min(max_rows, B8)
    if B8 >= 16:
        # Guarantee >=2 grid steps so the "parallel" axis can span both
        # TensorCores on megacore parts (v7x).
        cand = min(cand, max(8, (B8 // 2) // 8 * 8))
    n_steps = -(-B8 // cand)
    b_tile = _round_up(-(-B8 // n_steps), 8)
    while b_tile > max_rows and b_tile > 8:
        n_steps += 1
        b_tile = _round_up(-(-B8 // n_steps), 8)
    B_pad = n_steps * b_tile

    if B_pad != B:
        pad = B_pad - B
        ep = jnp.pad(ep, ((0, pad), (0, 0), (0, 0)))
        inv_len = jnp.pad(inv_len, ((0, pad), (0, 0)), constant_values=1.0)

    # f32 weights keep the matmul exact; bf16 weights are a conditional
    # optimization for wide H that is unnecessary while the kernel is HBM-bound.
    w1_f32 = w1.astype(jnp.float32)                    # (E, H)
    b1_2d = b1.reshape(1, H).astype(jnp.float32)       # (1, H)
    w2_row = w2.reshape(1, H).astype(jnp.float32)      # (1, H)
    b2_2d = b2.reshape(1, 1).astype(jnp.float32)       # (1, 1) scalar -> SMEM

    used = fixed + b_tile * per_row
    vmem_limit = int(max(16 << 20, min(vmem_cap - (8 << 20), used + (4 << 20))))

    out = pl.pallas_call(
        _linear_mlp_kernel,
        out_shape=jax.ShapeDtypeStruct((B_pad, 1), jnp.float32),
        grid_spec=pltpu.PrefetchScalarGridSpec(
            num_scalar_prefetch=0,
            grid=(n_steps,),
            in_specs=[
                # Streamed over the batch grid axis (double-buffered).
                pl.BlockSpec((b_tile, S, E), lambda i: (i, 0, 0)),
                pl.BlockSpec((b_tile, 1), lambda i: (i, 0)),
                # Weights / biases: constant index map -> VMEM-resident.
                pl.BlockSpec((E, H), lambda i: (0, 0)),
                pl.BlockSpec((1, H), lambda i: (0, 0)),
                pl.BlockSpec((1, H), lambda i: (0, 0)),
                # Scalar bias of the final layer lives in SMEM.
                pl.BlockSpec(memory_space=pltpu.MemorySpace.SMEM),
            ],
            out_specs=pl.BlockSpec((b_tile, 1), lambda i: (i, 0)),
        ),
        compiler_params=pltpu.CompilerParams(
            dimension_semantics=("parallel",),
            vmem_limit_bytes=vmem_limit),
    )(ep, inv_len, w1_f32, b1_2d, w2_row, b2_2d)

    return out[:B, 0]   # drop padding, squeeze(-1) -> (B,)


def _init_linear_params(key, fan_in, fan_out):
    """Deterministic PyTorch-style (Kaiming-uniform-ish) init."""
    kw, kb = jax.random.split(key)
    bound = 1.0 / np.sqrt(fan_in)
    w = jax.random.uniform(kw, (fan_in, fan_out), jnp.float32, -bound, bound)
    b = jax.random.uniform(kb, (fan_out,), jnp.float32, -bound, bound)
    return w, b


def _reference(epitope, mask, w1, b1, w2, b2):
    lengths = jnp.sum(mask, axis=1, keepdims=True)
    pooled = jnp.sum(epitope, axis=1) / lengths
    h = jnp.maximum(pooled @ w1 + b1, 0.0)
    return (h @ w2 + b2)[:, 0]


if __name__ == "__main__":
    root = jax.random.PRNGKey(0)

    # ---- case 1: module-consistent small shapes, default bf16 streaming ----
    B, S, E, H = 2, 8, 32, 16
    k_ep, k_l1, k_l2, root = jax.random.split(root, 4)
    epitope = jax.random.normal(k_ep, (B, S, E), jnp.float32)       # (B, S, E)
    valid = jnp.array([5, 7], dtype=jnp.int32)
    mask = (jnp.arange(S)[None, :] < valid[:, None]).astype(jnp.float32)
    antigen_full = jnp.zeros((B, 2), jnp.float32)   # unused by forward(), as in torch
    w1, b1 = _init_linear_params(k_l1, E, H)
    w2, b2 = _init_linear_params(k_l2, H, 1)

    out = linear_forward(epitope, mask, w1, b1, w2, b2,
                         antigen_full=antigen_full)
    jax.block_until_ready(out)
    # Kernel streams the epitope in bf16 -> quantize the reference input too.
    ep_q = epitope.astype(jnp.bfloat16).astype(jnp.float32)
    ref = _reference(ep_q, mask, w1, b1, w2, b2)
    np.testing.assert_allclose(np.asarray(out), np.asarray(ref),
                               rtol=1e-4, atol=1e-4)

    # ---- case 2: multi-step grid (batch padding, >=2 tiles), exact f32 -----
    B2, S2, E2, H2 = 37, 8, 32, 64
    k_ep2, k_len2, k_l1b, k_l2b = jax.random.split(root, 4)
    epitope2 = jax.random.normal(k_ep2, (B2, S2, E2), jnp.float32)
    valid2 = 1 + jax.random.randint(k_len2, (B2,), 0, S2)
    mask2 = (jnp.arange(S2)[None, :] < valid2[:, None]).astype(jnp.float32)
    w1b, b1b = _init_linear_params(k_l1b, E2, H2)
    w2b, b2b = _init_linear_params(k_l2b, H2, 1)

    out2 = linear_forward(epitope2, mask2, w1b, b1b, w2b, b2b,
                          input_dtype=jnp.float32)
    jax.block_until_ready(out2)
    ref2 = _reference(epitope2, mask2, w1b, b1b, w2b, b2b)
    np.testing.assert_allclose(np.asarray(out2), np.asarray(ref2),
                               rtol=1e-4, atol=1e-4)

    print("KERNEL_OK")
</pallas_src>

<mosaic_0001>
module attributes {stable_mosaic.version = 11 : i64} {
  func.func @_linear_mlp_kernel(%arg0: i32, %arg1: memref<8x8x32xbf16, #tpu.memory_space<vmem>>, %arg2: memref<8x1xf32, #tpu.memory_space<vmem>>, %arg3: memref<32x16xf32, #tpu.memory_space<vmem>>, %arg4: memref<1x16xf32, #tpu.memory_space<vmem>>, %arg5: memref<1x16xf32, #tpu.memory_space<vmem>>, %arg6: memref<1x1xf32, #tpu.memory_space<smem>>, %arg7: memref<8x1xf32, #tpu.memory_space<vmem>>) attributes {dimension_semantics = [#tpu.dimension_semantics<parallel>], iteration_bounds = array<i64: 1>, scalar_prefetch = 0 : i64, scratch_operands = 0 : i64, tpu.core_type = #tpu.core_type<tc>, window_params = [{transform_indices = @transform_0, window_bounds = array<i64: 8, 8, 32>}, {transform_indices = @transform_1, window_bounds = array<i64: 8, 1>}, {pipeline_mode = #tpu.pipeline_mode<synchronous>, transform_indices = @transform_2, window_bounds = array<i64: 32, 16>}, {pipeline_mode = #tpu.pipeline_mode<synchronous>, transform_indices = @transform_3, window_bounds = array<i64: 1, 16>}, {pipeline_mode = #tpu.pipeline_mode<synchronous>, transform_indices = @transform_4, window_bounds = array<i64: 1, 16>}, {transform_indices = @transform_5, window_bounds = array<i64: 1, 1>}, {transform_indices = @transform_6, window_bounds = array<i64: 8, 1>}]} {
    %c0 = arith.constant 0 : index
    %c0_0 = arith.constant 0 : index
    %c0_1 = arith.constant 0 : index
    %0 = vector.load %arg1[%c0, %c0_0, %c0_1] : memref<8x8x32xbf16, #tpu.memory_space<vmem>>, vector<8x8x32xbf16>
    %1 = arith.extf %0 : vector<8x8x32xbf16> to vector<8x8x32xf32>
    %cst = arith.constant dense<0.000000e+00> : vector<8x32xf32>
    %2 = vector.multi_reduction <add>, %1, %cst [1] : vector<8x8x32xf32> to vector<8x32xf32>
    %c0_2 = arith.constant 0 : index
    %c0_3 = arith.constant 0 : index
    %3 = vector.load %arg2[%c0_2, %c0_3] : memref<8x1xf32, #tpu.memory_space<vmem>>, vector<8x1xf32>
    %c0_4 = arith.constant 0 : index
    %c0_5 = arith.constant 0 : index
    %4 = vector.load %arg3[%c0_4, %c0_5] : memref<32x16xf32, #tpu.memory_space<vmem>>, vector<32x16xf32>
    %cst_6 = arith.constant dense<0.000000e+00> : vector<8x16xf32>
    %5 = tpu.matmul %2, %4, %cst_6 {dimension_numbers = #tpu.dot_dimension_numbers<[1], [0], [0], [1], [0, 0, 1, 1], [], []>} : vector<8x32xf32>, vector<32x16xf32>, vector<8x16xf32> -> vector<8x16xf32>
    %6 = vector.broadcast %3 : vector<8x1xf32> to vector<8x16xf32>
    %7 = arith.mulf %5, %6 : vector<8x16xf32>
    %c0_7 = arith.constant 0 : index
    %c0_8 = arith.constant 0 : index
    %8 = vector.load %arg4[%c0_7, %c0_8] : memref<1x16xf32, #tpu.memory_space<vmem>>, vector<1x16xf32>
    %9 = vector.broadcast %8 : vector<1x16xf32> to vector<8x16xf32>
    %10 = arith.addf %7, %9 : vector<8x16xf32>
    %cst_9 = arith.constant 0.000000e+00 : f32
    %11 = vector.broadcast %cst_9 : f32 to vector<8x16xf32>
    %12 = arith.maximumf %10, %11 : vector<8x16xf32>
    %c0_10 = arith.constant 0 : index
    %c0_11 = arith.constant 0 : index
    %13 = vector.load %arg5[%c0_10, %c0_11] : memref<1x16xf32, #tpu.memory_space<vmem>>, vector<1x16xf32>
    %14 = vector.broadcast %13 : vector<1x16xf32> to vector<8x16xf32>
    %15 = arith.mulf %12, %14 : vector<8x16xf32>
    %cst_12 = arith.constant dense<0.000000e+00> : vector<8xf32>
    %16 = vector.multi_reduction <add>, %15, %cst_12 [1] : vector<8x16xf32> to vector<8xf32>
    %17 = vector.shape_cast %16 : vector<8xf32> to vector<8x1xf32>
    %c0_13 = arith.constant 0 : index
    %c0_14 = arith.constant 0 : index
    %18 = memref.load %arg6[%c0_13, %c0_14] : memref<1x1xf32, #tpu.memory_space<smem>>
    %19 = vector.broadcast %18 : f32 to vector<8x1xf32>
    %20 = arith.addf %17, %19 : vector<8x1xf32>
    %c0_15 = arith.constant 0 : index
    %c0_16 = arith.constant 0 : index
    %21 = vector.load %arg7[%c0_15, %c0_16] : memref<8x1xf32, #tpu.memory_space<vmem>>, vector<8x1xf32>
    tpu.vector_store %arg7[%c0_15, %c0_16], %20 {strides = array<i32>} : memref<8x1xf32, #tpu.memory_space<vmem>>, vector<8x1xf32>,
    return
  }
  func.func @transform_0(%arg0: i32) -> (i32, i32, i32) {
    %c0_i32 = arith.constant 0 : i32
    %c0_i32_0 = arith.constant 0 : i32
    %c0_i32_1 = arith.constant 0 : i32
    return %arg0, %c0_i32, %c0_i32_0 : i32, i32, i32
  }
  func.func @transform_1(%arg0: i32) -> (i32, i32) {
    %c0_i32 = arith.constant 0 : i32
    %c0_i32_0 = arith.constant 0 : i32
    return %arg0, %c0_i32 : i32, i32
  }
  func.func @transform_2(%arg0: i32) -> (i32, i32) {
    %c0_i32 = arith.constant 0 : i32
    %c0_i32_0 = arith.constant 0 : i32
    %c0_i32_1 = arith.constant 0 : i32
    return %c0_i32, %c0_i32_0 : i32, i32
  }
  func.func @transform_3(%arg0: i32) -> (i32, i32) {
    %c0_i32 = arith.constant 0 : i32
    %c0_i32_0 = arith.constant 0 : i32
    %c0_i32_1 = arith.constant 0 : i32
    return %c0_i32, %c0_i32_0 : i32, i32
  }
  func.func @transform_4(%arg0: i32) -> (i32, i32) {
    %c0_i32 = arith.constant 0 : i32
    %c0_i32_0 = arith.constant 0 : i32
    %c0_i32_1 = arith.constant 0 : i32
    return %c0_i32, %c0_i32_0 : i32, i32
  }
  func.func @transform_5(%arg0: i32) -> (i32, i32) {
    %c0_i32 = arith.constant 0 : i32
    %c0_i32_0 = arith.constant 0 : i32
    %c0_i32_1 = arith.constant 0 : i32
    return %c0_i32, %c0_i32_0 : i32, i32
  }
  func.func @transform_6(%arg0: i32) -> (i32, i32) {
    %c0_i32 = arith.constant 0 : i32
    %c0_i32_0 = arith.constant 0 : i32
    return %arg0, %c0_i32 : i32, i32
  }
}

</mosaic_0001>

<bundles_post_ra>
// kernel: tpu_custom_call.1
= control target key start
LH: loop header
LB: loop body
LE: loop exit
PB: predicated region body
PF: predicated region fallthrough
CT: control target
= control target key end

     0   :  { %v274_v0 = vmov 0.0   ;;  %vm275_vm0 = vmmov 0   ;;  %vm40_vm1 = vcmask 261120   ;;  %vm110_vm2 = vcmask 1041409   ;;  %s362_s2 = inlined_call_operand.vmem [shape: f32[32,16], index: 2, kind: input, shape index: {}]   ;;  %s363_s0 = inlined_call_operand.vmem [shape: bf16[8,8,32], index: 0, kind: input, shape index: {}]   ;;  %s364_s1 = inlined_call_operand.vmem [shape: f32[8,1], index: 1, kind: input, shape index: {}]   ;;  %s365_s3 = inlined_call_operand.vmem [shape: f32[1,16], index: 3, kind: input, shape index: {}]   ;;  %s366_s4 = inlined_call_operand.vmem [shape: f32[1,16], index: 4, kind: input, shape index: {}]   ;;  %s367_s5 = inlined_call_operand.<no memory space> [shape: f32[1,1], index: 5, kind: input, shape index: {}]   ;;  %s368_s6 = inlined_call_operand.vmem [shape: f32[8,1], index: 6, kind: output, shape index: {}]  }
   0x1   :  { %259 = vmatprep.subr.mxu0 %v274_v0  ;;  %v101_v1 = vld [vmem:[%s362_s2 + $0x18] sm:$0xff]  ;;  %v100_v2 = vld [vmem:[%s362_s2 + $0x10] sm:$0xff]  ;;  %267 = vmatprep.mubr.msk.f32.mxu0 %vm275_vm0, %v274_v0  ;;  %v236_v3 = vld [vmem:[%s363_s0] sm:$0xff]   ;;  %vm112_vm3 = vcmask 1042434   ;;  %vm114_vm4 = vcmask 1043459   ;;  %vm116_vm5 = vcmask 1044484  }
   0x2   :  { %260 = vmatpush3.msra.mxu0 %v101_v1  ;;  %v251_v4 = vld [vmem:[%s363_s0 + $0x8] sm:$0xff]   ;;  %v237_v6 = vunpack.c.l.bf16 %v236_v3  ;;  %v238_v7 = vunpack.c.h.bf16 %v236_v3  ;;  %v252_v10 = vld [vmem:[%s363_s0 + $0x10] sm:$0xff]   ;;  %v253_v11 = vld [vmem:[%s363_s0 + $0x18] sm:$0xff]   ;;  %vm118_vm6 = vcmask 1045509   ;;  %vm120_vm7 = vcmask 1046534  }
   0x3   :  { %261 = vmatprep.subr.mxu0 %v274_v0  ;;  %v99_v5 = vld [vmem:[%s362_s2 + $0x8] sm:$0xff]  ;;  %v241_v8 = vunpack.c.l.bf16 %v251_v4  ;;  %v242_v9 = vunpack.c.h.bf16 %v251_v4  ;;  %v245_v12 = vunpack.c.l.bf16 %v252_v10  ;;  %v246_v13 = vunpack.c.h.bf16 %v252_v10  ;;  %v98_v16 = vld [vmem:[%s362_s2] sm:$0xff] }
   0x4   :  { %262 = vmatpush3.msra.mxu0 %v100_v2  ;;  %v249_v14 = vunpack.c.l.bf16 %v253_v11  ;;  %v250_v15 = vunpack.c.h.bf16 %v253_v11  ;;  %v41_v17 = vsel %vm40_vm1, %v237_v6, 0.0  ;;  %v48_v18 = vsel %vm40_vm1, %v238_v7, 0.0 }
   0x5   :  { %263 = vmatprep.subr.mxu0 %v274_v0  ;;  %v55_v19 = vsel %vm40_vm1, %v241_v8, 0.0  ;;  %v62_v20 = vsel %vm40_vm1, %v242_v9, 0.0  ;;  %v42_v21 = vrot.slane %v41_v17, 4  ;;  %v49_v22 = vrot.slane %v48_v18, 4 }
   0x6   :  { %264 = vmatpush3.msra.mxu0 %v99_v5  ;;  %v56_v23 = vrot.slane %v55_v19, 4  ;;  %v63_v24 = vrot.slane %v62_v20, 4  ;;  %v69_v25 = vsel %vm40_vm1, %v245_v12, 0.0  ;;  %v76_v26 = vsel %vm40_vm1, %v246_v13, 0.0  ;;  %v97_v5 = vld [vmem:[%s364_s1] sm:$0xff] }
   0x7   :  { %265 = vmatprep.subr.mxu0 %v274_v0  ;;  %v83_v27 = vsel %vm40_vm1, %v249_v14, 0.0  ;;  %v90_v28 = vsel %vm40_vm1, %v250_v15, 0.0  ;;  %v43_v29 = vadd.f32 %v42_v21, %v41_v17  ;;  %v50_v30 = vadd.f32 %v49_v22, %v48_v18 }
   0x8   :  { %266 = vmatpush3.msra.mxu0 %v98_v16  ;;  %v57_v31 = vadd.f32 %v56_v23, %v55_v19  ;;  %v64_v32 = vadd.f32 %v63_v24, %v62_v20  ;;  %v70_v33 = vrot.slane %v69_v25, 4  ;;  %v77_v34 = vrot.slane %v76_v26, 4  ;;  %v233_v20 = vld [vmem:[%s365_s3] ss:$0 sm:$0xff] }
   0x9   :  { %v84_v35 = vrot.slane %v83_v27, 4  ;;  %v91_v36 = vrot.slane %v90_v28, 4  ;;  %v44_v37 = vrot.slane %v43_v29, 2  ;;  %v51_v38 = vrot.slane %v50_v30, 2  ;;  %v234_v24 = vld [vmem:[%s366_s4] ss:$0 sm:$0xff] }
   0xa   :  { %v58_v39 = vrot.slane %v57_v31, 2  ;;  %v65_v40 = vrot.slane %v64_v32, 2  ;;  %v71_v41 = vadd.f32 %v70_v33, %v69_v25  ;;  %v78_v42 = vadd.f32 %v77_v34, %v76_v26 }
   0xb   :  { %v85_v43 = vadd.f32 %v84_v35, %v83_v27  ;;  %v92_v44 = vadd.f32 %v91_v36, %v90_v28  ;;  %v45_v45 = vadd.f32 %v44_v37, %v43_v29  ;;  %v52_v46 = vadd.f32 %v51_v38, %v50_v30 }
   0xc   :  { %v59_v47 = vadd.f32 %v58_v39, %v57_v31  ;;  %v66_v48 = vadd.f32 %v65_v40, %v64_v32  ;;  %v72_v49 = vrot.slane %v71_v41, 2  ;;  %v79_v50 = vrot.slane %v78_v42, 2 }
   0xd   :  { %v86_v51 = vrot.slane %v85_v43, 2  ;;  %v93_v52 = vrot.slane %v92_v44, 2  ;;  %v46_v53 = vrot.slane %v45_v45, 1  ;;  %v53_v54 = vrot.slane %v52_v46, 1 }
   0xe   :  { %v60_v55 = vrot.slane %v59_v47, 1  ;;  %v67_v56 = vrot.slane %v66_v48, 1  ;;  %v73_v57 = vadd.f32 %v72_v49, %v71_v41  ;;  %v80_v58 = vadd.f32 %v79_v50, %v78_v42 }
   0xf   :  { %v87_v59 = vadd.f32 %v86_v51, %v85_v43  ;;  %v94_v60 = vadd.f32 %v93_v52, %v92_v44  ;;  %v47_v61 = vadd.f32 %v46_v53, %v45_v45  ;;  %v54_v62 = vadd.f32 %v53_v54, %v52_v46 }
  0x10   :  { %v61_v63 = vadd.f32 %v60_v55, %v59_v47  ;;  %v68_v0 = vadd.f32 %v67_v56, %v66_v48  ;;  %v74_v1 = vrot.slane %v73_v57, 1  ;;  %v81_v2 = vrot.slane %v80_v58, 1 }
  0x11   :  { %v88_v3 = vrot.slane %v87_v59, 1  ;;  %v95_v4 = vrot.slane %v94_v60, 1  ;;  %v111_v6 = vsel %vm110_vm2, %v54_v62, %v47_v61  ;;  %v276_v9 = vmov 0  }
  0x12   :  { %v75_v7 = vadd.f32 %v74_v1, %v73_v57  ;;  %v82_v8 = vadd.f32 %v81_v2, %v80_v58  ;;  %273 = vset.pattern.permute.xlu0 %v276_v9  ;;  %v113_v11 = vsel %vm112_vm3, %v61_v63, %v111_v6  ;;  %vm122_vm8 = vcmask 1047559  }
  0x13   :  { %v89_v10 = vadd.f32 %v88_v3, %v87_v59  ;;  %198 = vperm.xlu0 %273, %v97_v5   ;;  %v96_v12 = vadd.f32 %v95_v4, %v94_v60  ;;  %v115_v13 = vsel %vm114_vm4, %v68_v0, %v113_v11  ;;  %vm219_vm9 = vcmask 130048  }
  0x14   :  { %v117_v14 = vsel %vm116_vm5, %v75_v7, %v115_v13  ;;  %v224_v28 = vstv %s367_s5  ;;  %vm226_vm10 = vcmask 7168  }
  0x15   :  { %v119_v15 = vsel %vm118_vm6, %v82_v8, %v117_v14 }
  0x16   :  { %v121_v16 = vsel %vm120_vm7, %v89_v10, %v119_v15 }
  0x17   :  { %v123_v17 = vsel %vm122_vm8, %v96_v12, %v121_v16 }
  0x18   :  { %268 = vmatmul.mubr.msk.f32.vlgmr.msra.gmra.mxu0 %vm40_vm1, %v123_v17 }
  0x8e   :  { %v199_v18 = vpop.permute.xlu0 %198 }
  0xd8   :  { %v192_v19 = vpop.f32.mrf.mxu0 }
  0xd9   :  { %v201_v21 = vmul.f32 %v199_v18, %v192_v19 }
  0xda   :  { %v269_v22 = vpop.f32.mrf.mxu0 }
  0xdb   :  { %v209_v23 = vadd.f32 %v233_v20, %v201_v21 }
  0xdd   :  { %v210_v25 = vmax.f32 %v209_v23, 0.0 }
  0xdf   :  { %v218_v26 = vmul.f32 %v234_v24, %v210_v25 }
  0xe1   :  { %v220_v27 = vsel %vm219_vm9, %v218_v26, 0.0 }
  0xe2   :  { %221 = vadd.xlane.f32.xlu0 %v220_v27 }
 0x16b   :  { %v222_v29 = vpop.xlane.xlu0 %221 }
 0x16c   :  { %v225_v30 = vadd.f32 %v224_v28, %v222_v29 }
 0x16e   :  { %227 = vst.msk [vmem:[%s368_s6] sm:$0xff] %vm226_vm10, %v225_v30 }

</bundles_post_ra>
